<compile_context>
chip_gen: v7x
topology: tpu7x:2x2x1
jax: 0.10.0
libtpu: 0.0.40
codegen_flags: <defaults>
</compile_context>

<pallas_src>
import functools

import jax
import jax.numpy as jnp
from jax.experimental import pallas as pl
from jax.experimental.pallas import tpu as pltpu


def _scale_kernel(x_ref, o_ref, *, fn, scale):
    # One (tm, bw) VMEM tile: apply `fn` elementwise and multiply by the
    # constant-folded `scale`.  Compute stays in the input dtype.
    o_ref[...] = (fn(x_ref[...]) * scale).astype(o_ref.dtype)


def _round_up(a, b):
    return ((a + b - 1) // b) * b


def _pick_tile_bytes():
    """Per-generation budget for ONE tile buffer (4 live: double-buffered in+out)."""
    try:
        kind = jax.devices()[0].device_kind.lower()
    except Exception:
        kind = ""
    if "v6" in kind or "v7" in kind:
        # v6e: 32 MiB scoped default / 128 MiB physical.
        # v7x: 32 MiB scoped default / 64 MiB physical -> 4x4 MiB = 16 MiB is safe.
        return 4 << 20
    # v5e (16 MiB scoped default) and unknown chips: stay conservative.
    return 2 << 20


class Scale:
    """JAX/Pallas equivalent of the PyTorch `Scale` module: fn(x) * scale.

    NOTE: `fn` is fused into the kernel and applied per (row-tile, lane-tile)
    block of a 2-D (collapsed-leading-dims, last-dim) view of x, so it MUST be
    elementwise.  Non-elementwise fns (softmax / layernorm / ...) are NOT
    supported by this fused kernel.

    `scale` is folded in as a weak-typed Python constant, so for bf16 inputs
    the multiply happens in bf16 (may differ at ULP level from a framework
    holding a float32 scale parameter).
    """

    def __init__(self, scale, fn):
        self.scale = float(scale)
        self.fn = fn

    def __call__(self, x):
        orig_shape = x.shape

        # ---- 2-D view (no pad, no slice, no lane relayout).
        if x.ndim == 0:
            x2 = x.reshape(1, 1)
        elif x.ndim == 1:
            x2 = x.reshape(1, -1)
        else:
            x2 = x.reshape(-1, orig_shape[-1])
        m, d = x2.shape

        itemsize = jnp.dtype(x.dtype).itemsize
        sublane = {4: 8, 2: 16, 1: 32}.get(itemsize, 8)
        tile_bytes = _pick_tile_bytes()

        # ---- lane (width) block: full last dim, or a 128-multiple split of
        #      it when the last dim is both 128-aligned and very wide.
        bw = d
        if d % 128 == 0:
            while bw % 256 == 0 and bw * sublane * itemsize > tile_bytes:
                bw //= 2
        n_lane_blocks = pl.cdiv(d, bw)

        # ---- row block: largest sublane multiple that fits the budget.
        if m <= sublane:
            tm = m                                     # full (possibly tiny) dim
        else:
            tm_max = max(sublane,
                         (tile_bytes // max(1, bw * itemsize)) // sublane * sublane)
            if tm_max >= m:
                # Whole row dim fits in one tile.  Split into two blocks when
                # possible so v7x's 2 TensorCores both get work (harmless
                # no-op cost on single-TC v5e/v6e).
                if n_lane_blocks == 1 and m >= 2 * sublane:
                    tm = _round_up(pl.cdiv(m, 2), sublane)
                    if tm >= m:
                        tm = m
                else:
                    tm = m
            else:
                tm = tm_max
                # Balance blocks so the final (partial) block is as full as possible.
                n_row_blocks = pl.cdiv(m, tm)
                tm = max(sublane,
                         min(tm, _round_up(pl.cdiv(m, n_row_blocks), sublane)))
        n_row_blocks = pl.cdiv(m, tm)

        grid = (n_row_blocks, n_lane_blocks)

        kernel = functools.partial(_scale_kernel, fn=self.fn, scale=self.scale)

        compiler_kwargs = dict(dimension_semantics=("parallel", "parallel"))
        # Only raise the scoped-VMEM limit if an unusually wide ragged last dim
        # forces a tile bigger than the per-generation budget.
        vmem_needed = 4 * tm * bw * itemsize + (2 << 20)
        if vmem_needed > (12 << 20):
            compiler_kwargs["vmem_limit_bytes"] = min(vmem_needed, 48 << 20)
        # TODO(synk): optionally pass input_output_aliases={0: 0} when the
        # caller donates x, to halve peak HBM allocation.

        out2 = pl.pallas_call(
            kernel,
            out_shape=jax.ShapeDtypeStruct((m, d), x.dtype),
            grid=grid,
            in_specs=[pl.BlockSpec((tm, bw), lambda i, j: (i, j))],
            out_specs=pl.BlockSpec((tm, bw), lambda i, j: (i, j)),
            compiler_params=pltpu.CompilerParams(**compiler_kwargs),
        )(x2)

        return out2.reshape(orig_shape)


if __name__ == "__main__":
    key = jax.random.PRNGKey(0)

    scale_value = 0.5
    # tanh-approx GELU (jax.nn.gelu default) keeps the fused fn on the cheap
    # EUP path; stays HBM-bound on all generations.
    module = Scale(scale_value, jax.nn.gelu)

    # 1) Typical small activation shape (batch=2, seq=8, hidden=32).
    x = jax.random.normal(key, (2, 8, 32), dtype=jnp.float32)
    out = jax.block_until_ready(module(x))
    ref = jax.nn.gelu(x) * scale_value
    assert out.shape == x.shape and out.dtype == x.dtype
    assert jnp.allclose(out, ref, atol=1e-5, rtol=1e-5)

    # 2) Ragged shape (last dim not a multiple of 128): exercises the
    #    full-extent lane block + partial row block path — no pad / slice.
    x2 = jax.random.normal(jax.random.PRNGKey(1), (4, 9, 40), dtype=jnp.float32)
    out2 = jax.block_until_ready(module(x2))
    ref2 = jax.nn.gelu(x2) * scale_value
    assert out2.shape == x2.shape and out2.dtype == x2.dtype
    assert jnp.allclose(out2, ref2, atol=1e-5, rtol=1e-5)

    # 3) Lane-dense shape (last dim multiple of 128): unmasked vst path.
    x3 = jax.random.normal(jax.random.PRNGKey(2), (2, 8, 256), dtype=jnp.float32)
    out3 = jax.block_until_ready(module(x3))
    ref3 = jax.nn.gelu(x3) * scale_value
    assert out3.shape == x3.shape and out3.dtype == x3.dtype
    assert jnp.allclose(out3, ref3, atol=1e-5, rtol=1e-5)

    print("KERNEL_OK")
</pallas_src>

<mosaic_0001>
module attributes {stable_mosaic.version = 11 : i64} {
  func.func @_scale_kernel(%arg0: i32, %arg1: i32, %arg2: memref<8x32xf32, #tpu.memory_space<vmem>>, %arg3: memref<8x32xf32, #tpu.memory_space<vmem>>) attributes {dimension_semantics = [#tpu.dimension_semantics<parallel>, #tpu.dimension_semantics<parallel>], iteration_bounds = array<i64: 2, 1>, scalar_prefetch = 0 : i64, scratch_operands = 0 : i64, tpu.core_type = #tpu.core_type<tc>, window_params = [{transform_indices = @transform_0, window_bounds = array<i64: 8, 32>}, {transform_indices = @transform_1, window_bounds = array<i64: 8, 32>}]} {
    %c0 = arith.constant 0 : index
    %c0_0 = arith.constant 0 : index
    %0 = vector.load %arg2[%c0, %c0_0] : memref<8x32xf32, #tpu.memory_space<vmem>>, vector<8x32xf32>
    %1 = arith.mulf %0, %0 : vector<8x32xf32>
    %2 = arith.mulf %0, %1 : vector<8x32xf32>
    %cst = arith.constant 4.471500e-02 : f32
    %3 = vector.broadcast %cst : f32 to vector<8x32xf32>
    %4 = arith.mulf %3, %2 : vector<8x32xf32>
    %5 = arith.addf %0, %4 : vector<8x32xf32>
    %cst_1 = arith.constant 0.797884583 : f32
    %6 = vector.broadcast %cst_1 : f32 to vector<8x32xf32>
    %7 = arith.mulf %6, %5 : vector<8x32xf32>
    %8 = math.tanh %7 : vector<8x32xf32>
    %cst_2 = arith.constant 1.000000e+00 : f32
    %9 = vector.broadcast %cst_2 : f32 to vector<8x32xf32>
    %10 = arith.addf %9, %8 : vector<8x32xf32>
    %cst_3 = arith.constant 5.000000e-01 : f32
    %11 = vector.broadcast %cst_3 : f32 to vector<8x32xf32>
    %12 = arith.mulf %11, %10 : vector<8x32xf32>
    %13 = arith.mulf %0, %12 : vector<8x32xf32>
    %cst_4 = arith.constant 5.000000e-01 : f32
    %14 = vector.broadcast %cst_4 : f32 to vector<8x32xf32>
    %15 = arith.mulf %13, %14 : vector<8x32xf32>
    %c0_5 = arith.constant 0 : index
    %c0_6 = arith.constant 0 : index
    %16 = vector.load %arg3[%c0_5, %c0_6] : memref<8x32xf32, #tpu.memory_space<vmem>>, vector<8x32xf32>
    tpu.vector_store %arg3[%c0_5, %c0_6], %15 {strides = array<i32>} : memref<8x32xf32, #tpu.memory_space<vmem>>, vector<8x32xf32>,
    return
  }
  func.func @transform_0(%arg0: i32, %arg1: i32) -> (i32, i32) {
    %c0_i32 = arith.constant 0 : i32
    return %arg0, %arg1 : i32, i32
  }
  func.func @transform_1(%arg0: i32, %arg1: i32) -> (i32, i32) {
    %c0_i32 = arith.constant 0 : i32
    return %arg0, %arg1 : i32, i32
  }
}

</mosaic_0001>

<bundles_post_ra>
// kernel: tpu_custom_call.1
= control target key start
LH: loop header
LB: loop body
LE: loop exit
PB: predicated region body
PF: predicated region fallthrough
CT: control target
= control target key end

     0   :  { %6 = vsyncpa [#allocation3], 0  ;;  %s632_s0 = inlined_call_operand.hbm [shape: f32[16,32], index: 0, kind: input, shape index: {}]   ;;  %s633_s1 = inlined_call_operand.hbm [shape: f32[16,32], index: 1, kind: output, shape index: {}]  }
   0x1   :  { %8 = vsyncpa [#allocation3 + $0x1], 0 }
   0x2   :  { %9 = vsyncpa [#allocation4], 0 }
   0x3   :  { %11 = vsyncpa [#allocation4 + $0x1], 0  ;;  %s460_s6 = smov 0   ;;  %s462_s7 = smov 0  }
   0x4   :  { %s464_s8 = smov 0   ;;  %s466_s9 = smov 0  }
   0x5   :  { %s468_s10 = smov 0   ;;  %s470_s11 = smov 0  }
   0x6 LB: > { %s257_s12 = sadd.s32 4294967295, %s446_s11   ;;  %s258_s13 = sadd.s32 4294967294, %s446_s11   ;;  %s446_s11 = sphi %s470_s11, %s17_s11   ;;  %s442_s10 = sphi %s468_s10, %s649_s10   ;;  %s438_s9 = sphi %s466_s9, %s648_s9   ;;  %s434_s8 = sphi %s464_s8, %s647_s8   ;;  %s430_s7 = sphi %s462_s7, %s646_s7   ;;  %s426_s6 = sphi %s460_s6, %s645_s6  }
   0x7   : > { %s29_s14 = sadd.s32 1, %s442_s10  ;;  %s38_s15 = sadd.s32 1, %s434_s8 }
   0x8   : > { %p31_p0 = scmp.ge.s32.totalorder %s29_s14, 2  ;;  %p45_p1 = scmp.ne.s32.totalorder %s434_s8, %s430_s7 }
   0x9   : > { %p46_p2 = scmp.eq.s32.totalorder %s446_s11, 0  ;;  %p51_p3 = scmp.ne.s32.totalorder %s430_s7, %s426_s6 }
   0xa   : > { %s651_s14 = smov (%p31_p0, %s29_s14), 0  ;;  %p52_p5 = scmp.eq.s32.totalorder %s257_s12, 0 }
   0xb   : > { %p501_p4 = por %p46_p2, %p45_p1  ;;  %s33_s17 = ssub.s32 %s442_s10, %s651_s14 }
   0xc   : > { %p77_p6 = scmp.eq.s32.totalorder %s257_s12, 1  ;;  %p36_p7 = scmp.eq.s32.totalorder %s33_s17, 0 }
   0xd   : > { %p507_p8 = por %p52_p5, %p51_p3  ;;  %p83_p10 = scmp.eq.s32.totalorder %s258_s13, 1 }
   0xe   : > { %p511_p9 = por %p77_p6, %p45_p1  ;;  %p282_p13 = scmp.lt.s32.totalorder %s446_s11, 2 }
   0xf   : > { %s516_s20 = scalar_select %p36_p7, %s434_s8, %s38_s15  }
  0x10   : > { %s637_s19 = scalar_select %p511_p9, 1, 0 }
  0x11   : > { %p518_p11 = por %p83_p10, %p51_p3  ;;  %s103_s22 = sand.u32 1, %s434_s8  }
  0x12   : > { %s261_s23 = sshll.u32 %s103_s22, 3  ;;  %s262_s24 = sshll.u32 %s442_s10, 7 }
  0x13   : > { %s638_s21 = scalar_select %p518_p11, 1, 0 }
  0x14   : > { %s529_s27 = scalar_lea.hbm %s632_s0, %s262_s24  ;;  %s107_s28 = scalar_lea.vmem [#allocation2], %s261_s23 }
  0x15   : > { %s115_s29 = sshll.u32 %s107_s28, 4  ;;  %p535_p0 = pnand %p282_p13, %p501_p4  ;;  %s531_s29 = int_to_ptr.vmem [resolvable:$true] %s115_s29 }
  0x16   : > { %s104_s2 = scalar_lea.sflag [#allocation3], %s103_s22  ;;  %s334_s3 = scalar_lea.hbm %s529_s27, 128 }
  0x17   : > { %p335_p3 = scmp.ne.s32.totalorder %s529_s27, %s334_s3  ;;  %p336_p5 = pneg %p535_p0 }
  0x18   : > { %s339_s12 = scalar_lea.hbm %s632_s0, 256  ;;  %p340_p4 = scmp.lt.u32.totalorder %s529_s27, %s632_s0 }
  0x19   : > { %p337_p6 = pnand %p336_p5, %p335_p3  ;;  %p341_p10 = scmp.lt.u32.totalorder %s339_s12, %s334_s3 }
  0x1a   : > { %p343_p12 = scmp.lt.u32.totalorder %s334_s3, %s529_s27 }
  0x1b   : > { %p338_p7 = pneg %p337_p6  ;;  %p342_p13 = por %p341_p10, %p340_p4 }
  0x1d   : > { %p344_p1 = por %p343_p12, %p342_p13 }
  0x1f   : > { %p345_p2 = pnand %p344_p1, %p338_p7 }
  0x21   : > { %348 = shalt.err (!%p345_p2)
}
  0x22   : > { %s349_s16 = scalar_lea.vmem %s531_s29, 128  ;;  %s448_s17 = smov [#allocation2]  }
  0x23   : > { %p350_p3 = scmp.ne.s32.totalorder %s531_s29, %s349_s16  ;;  %s354_s22 = sshll.u32 %s448_s17, 4  ;;  %s355_s22 = int_to_ptr.vmem [resolvable:$false] %s354_s22 }
  0x24   : > { %s356_s23 = scalar_lea.vmem %s355_s22, 256  ;;  %p357_p9 = scmp.lt.s32.totalorder %s531_s29, %s355_s22 }
  0x25   : > { %p352_p6 = pnand %p350_p3, %p336_p5  ;;  %p358_p4 = scmp.lt.s32.totalorder %s356_s23, %s349_s16 }
  0x27   : > { %p353_p11 = pneg %p352_p6  ;;  %p359_p10 = por %p358_p4, %p357_p9 }
  0x29   : > { %p360_p12 = pnand %p359_p10, %p353_p11 }
  0x2b   : > { %363 = shalt.err (!%p360_p12)
}
  0x2c   : > { %277 = dma.hbm_to_vmem [thread:$0]  (!%p535_p0), %s529_s27, 128, %s531_s29, %s104_s2  }
  0x2d   : > { %p640_p1 = scmp.lt.s32.totalorder %s446_s11, 3  ;;  %p641_p2 = scmp.ge.s32.totalorder %s446_s11, 1 }
  0x2f   : > { %p121_p5 = pnand %p641_p2, %p640_p1 }
  0x30   : > { %s571_s24 = sand.u32 (!%p121_p5), 1, %s430_s7  }
  0x31   : > { %124 = sbr.rel (%p121_p5) target bundleno = 101 (0x65), region = 24  ;;  %s264_s25 = sshll.u32 (!%p121_p5), %s571_s24, 3 }
  0x32   : > { %s127_s26 = scalar_lea.sflag (!%p121_p5), [#allocation3], %s571_s24  ;;  %s130_s28 = scalar_lea.vmem (!%p121_p5), [#allocation2], %s264_s25 }
  0x38   : > { %417 = dma.done.wait (%p507_p8), %s127_s26, 128  }
  0x39   : > { %419 = vsyncadd (%p507_p8), %s127_s26, 4294967168  ;;  %v149_v0 = vld [vmem:[%s130_s28] sm:$0xff]  ;;  %s148_s27 = scalar_lea.vmem [#allocation5], %s264_s25  ;;  %s267_s30 = sshll.u32 %s438_s9, 7  ;;  %vm160_vm0 = vcmask 261120  }
  0x3a   : > { %v150_v1 = vmul.f32 %v149_v0, %v149_v0  ;;  %s177_s29 = sshll.u32 %s148_s27, 4  ;;  %s585_s3 = scalar_lea.hbm %s633_s1, %s267_s30  ;;  %s580_s29 = int_to_ptr.vmem [resolvable:$true] %s177_s29 }
  0x3b   : > { %s163_s4 = scalar_lea.sflag [#allocation4], %s571_s24  ;;  %s364_s5 = scalar_lea.vmem %s580_s29, 128 }
  0x3c   : > { %v151_v2 = vmul.f32 %v150_v1, %v149_v0  ;;  %p365_p8 = scmp.ne.s32.totalorder %s580_s29, %s364_s5  ;;  %p642_p9 = scmp.ne.s32.totalorder %s637_s19, 0 }
  0x3d   : > { %s449_s9 = smov [#allocation5]  }
  0x3e   : > { %v152_v3 = vmul.f32 0.044715, %v151_v2  ;;  %p366_p11 = pnand %p365_p8, %p642_p9  ;;  %s368_s12 = sshll.u32 %s449_s9, 4  ;;  %s369_s12 = int_to_ptr.vmem [resolvable:$false] %s368_s12 }
  0x3f   : > { %s370_s13 = scalar_lea.vmem %s369_s12, 256  ;;  %p371_p7 = scmp.lt.s32.totalorder %s580_s29, %s369_s12 }
  0x40   : > { %v153_v4 = vadd.f32 %v152_v3, %v149_v0  ;;  %p367_p0 = pneg %p366_p11  ;;  %p372_p13 = scmp.lt.s32.totalorder %s370_s13, %s364_s5 }
  0x42   : > { %v154_v5 = vmul.f32 0.7978846, %v153_v4  ;;  %p373_p3 = por %p372_p13, %p371_p7 }
  0x44   : > { %332 = vtanh.f32 %v154_v5  ;;  %p374_p6 = pnand %p373_p3, %p367_p0 }
  0x4e   : > { %v333_v6 = vpop.eup %332 }
  0x4f   : > { %v156_v7 = vadd.f32 1.0, %v333_v6 }
  0x51   : > { %v157_v8 = vmul.f32 0.5, %v156_v7 }
  0x53   : > { %v158_v9 = vmul.f32 %v157_v8, %v149_v0 }
  0x55   : > { %v159_v10 = vmul.f32 0.5, %v158_v9 }
  0x57   : > { %161 = vst.msk [vmem:[%s148_s27] sm:$0xff] %vm160_vm0, %v159_v10 }
  0x58   : > { %377 = shalt.err (!%p374_p6)
}
  0x59   : > { %s378_s15 = scalar_lea.hbm %s585_s3, 128  ;;  %s382_s22 = scalar_lea.hbm %s633_s1, 256 }
  0x5a   : > { %p379_p4 = scmp.ne.s32.totalorder %s585_s3, %s378_s15  ;;  %p383_p1 = scmp.lt.u32.totalorder %s585_s3, %s633_s1 }
  0x5b   : > { %p384_p2 = scmp.lt.u32.totalorder %s382_s22, %s378_s15  ;;  %p386_p8 = scmp.lt.u32.totalorder %s378_s15, %s585_s3 }
  0x5c   : > { %p380_p10 = pnand %p379_p4, %p642_p9 }
  0x5d   : > { %p385_p5 = por %p384_p2, %p383_p1 }
  0x5e   : > { %p381_p12 = pneg %p380_p10 }
  0x5f   : > { %p387_p11 = por %p386_p8, %p385_p5 }
  0x61   : > { %p388_p0 = pnand %p387_p11, %p381_p12 }
  0x63   : > { %391 = shalt.err (!%p388_p0)
}
  0x64   : > { %272 = dma.vmem_to_hbm [thread:$0]  (%p642_p9), %s580_s29, 128, %s585_s3, %s163_s4  }
  0x65 PF: > { %s189_s25 = sand.u32 1, %s426_s6   ;;  %p643_p7 = scmp.ne.s32.totalorder %s638_s21, 0 }
  0x66   : > { %p644_p13 = scmp.ge.s32.totalorder %s446_s11, 2  ;;  %s190_s26 = scalar_lea.sflag [#allocation4], %s189_s25 }
  0x68   : > { %p279_p3 = pnand %p644_p13, %p643_p7 }
  0x6a   : > { %421 = dma.done.wait (!%p279_p3), %s190_s26, 128  }
  0x6b   : > { %423 = vsyncadd (!%p279_p3), %s190_s26, 4294967168  ;;  %s17_s11 = sadd.s32 1, %s446_s11   ;;  %s645_s6 = smov %s430_s7 }
  0x6c   : > { %p14_p6 = scmp.ge.s32.totalorder %s17_s11, 4   ;;  %s646_s7 = smov %s434_s8 }
  0x6d   : > { %s647_s8 = smov %s516_s20  ;;  %s648_s9 = smov %s442_s10 }
  0x6e   : > { %s649_s10 = smov %s651_s14  ;;  %16 = sbr.rel (!%p14_p6) target bundleno = 6 (0x6), region = 69 }
  0x75   :  { %195 = vsyncpa [#allocation3], 1 }
  0x76   :  { %197 = vsyncpa [#allocation3 + $0x1], 1 }
  0x77   :  { %198 = vsyncpa [#allocation4], 1 }
  0x78   :  { %200 = vsyncpa [#allocation4 + $0x1], 1 }

</bundles_post_ra>
